<compile_context>
chip_gen: v5e
topology: v5e:2x2
jax: 0.10.0
libtpu: 0.0.40
codegen_flags: <defaults>
</compile_context>

<pallas_src>
import functools
import math

import jax
import jax.numpy as jnp
from jax.experimental import pallas as pl
from jax.experimental.pallas import tpu as pltpu

LANE = 128      # lane width: last dim padded to a multiple of this
SUBLANE = 8     # sublane width: batch tile must be a multiple of this


def _round_up(x, m):
    return (x + m - 1) // m * m


def _fused_mlp_kernel(x_ref, *refs, num_layer):
    """Fused MLP on one batch tile.

    x_ref : [TILE_B, F_in_pad]  bf16
    refs  : (w0, b0, w1, b1, ..., w_{L-1}, b_{L-1}, o_ref)
            w_l : [F_prev_pad, F_out_pad] bf16 (VMEM-resident across grid)
            b_l : [1, F_out_pad]          f32
    o_ref : [TILE_B, F_out_pad] f32
    """
    o_ref = refs[-1]
    h = x_ref[...]  # bf16 activations, stay on-chip across all layers
    for layer in range(num_layer):
        w_ref = refs[2 * layer]
        b_ref = refs[2 * layer + 1]
        # MXU matmul with f32 accumulation.
        y = jnp.dot(h, w_ref[...], preferred_element_type=jnp.float32)
        y = y + b_ref[...]  # f32 bias, broadcast [1, F_out_pad] over batch
        if layer < num_layer - 1:
            # f32 sigmoid (EUP), cast back to bf16 only to feed the next MXU pass.
            h = jax.nn.sigmoid(y).astype(jnp.bfloat16)
        else:
            o_ref[...] = y.astype(o_ref.dtype)


def init_mlp_params(key, feat_in, feat_out, num_layer):
    """Parameters matching the module's layer shapes, stored padded + bf16.

    Weights: [F_in_pad, F_out_pad] bf16, zero-padded (pad rows/cols are zero
    so padded lanes never contaminate real outputs).
    Biases : [1, F_out_pad] f32, zero-padded.
    """
    f_out_pad = _round_up(feat_out, LANE)
    params = []
    in_dim = feat_in
    in_pad = _round_up(feat_in, LANE)
    for _ in range(num_layer):
        key, kw, kb = jax.random.split(key, 3)
        bound = 1.0 / math.sqrt(in_dim)  # PyTorch Linear default scale
        w = jax.random.uniform(kw, (in_dim, feat_out), jnp.float32, -bound, bound)
        b = jax.random.uniform(kb, (feat_out,), jnp.float32, -bound, bound)
        w_pad = (jnp.zeros((in_pad, f_out_pad), jnp.bfloat16)
                 .at[:in_dim, :feat_out].set(w.astype(jnp.bfloat16)))
        b_pad = jnp.zeros((1, f_out_pad), jnp.float32).at[0, :feat_out].set(b)
        params.append((w_pad, b_pad))
        in_dim = feat_out
        in_pad = f_out_pad
    return params


@functools.partial(jax.jit, static_argnames=("feat_in", "feat_out"))
def mlp_forward(x, params, *, feat_in, feat_out):
    """Forward pass: single fused pallas_call over batch tiles."""
    num_layer = len(params)
    B = x.shape[0]
    f_in_pad = params[0][0].shape[0]
    f_out_pad = params[-1][0].shape[1]

    # Batch tiling: multiple of 8 sublanes, up to 256 rows per tile.
    tile_b = min(256, _round_up(B, SUBLANE))
    b_pad = _round_up(B, tile_b)

    # Pad + cast the input once (lane-dense, bf16 for the MXU).
    x_p = jnp.zeros((b_pad, f_in_pad), jnp.bfloat16)
    x_p = x_p.at[:B, :feat_in].set(x.astype(jnp.bfloat16))

    flat_params = []
    in_specs = [pl.BlockSpec((tile_b, f_in_pad), lambda i: (i, 0))]
    for (w, b) in params:
        flat_params.append(w)
        flat_params.append(b)
        # Weights/biases: same block for every grid step -> VMEM-resident.
        in_specs.append(pl.BlockSpec(w.shape, lambda i: (0, 0)))
        in_specs.append(pl.BlockSpec(b.shape, lambda i: (0, 0)))

    # VMEM budget: resident params + double-buffered input/output tiles
    # + live intermediates, with headroom. Clamped so it is safe on v7x (64 MiB).
    param_bytes = sum(int(a.size) * a.dtype.itemsize for a in flat_params)
    io_bytes = 2 * tile_b * f_in_pad * 2 + 2 * tile_b * f_out_pad * 4
    inter_bytes = 4 * tile_b * max(f_in_pad, f_out_pad) * 4
    vmem_limit = int(min(max(param_bytes + io_bytes + inter_bytes + (4 << 20),
                             16 << 20), 48 << 20))

    kernel = functools.partial(_fused_mlp_kernel, num_layer=num_layer)
    out = pl.pallas_call(
        kernel,
        out_shape=jax.ShapeDtypeStruct((b_pad, f_out_pad), jnp.float32),
        grid=(b_pad // tile_b,),
        in_specs=in_specs,
        out_specs=pl.BlockSpec((tile_b, f_out_pad), lambda i: (i, 0)),
        compiler_params=pltpu.CompilerParams(
            dimension_semantics=("parallel",),   # v7x megacore shards batch tiles
            vmem_limit_bytes=vmem_limit,
        ),
    )(x_p, *flat_params)

    return out[:B, :feat_out]


def _reference_forward(x, params, feat_in, feat_out):
    """Pure-JAX f32 reference (uses the same bf16-stored weights, upcast)."""
    n = len(params)
    h = x
    in_dim = feat_in
    for idx, (w_pad, b_pad) in enumerate(params):
        w = w_pad[:in_dim, :feat_out].astype(jnp.float32)
        b = b_pad[0, :feat_out]
        h = h @ w + b
        if idx < n - 1:
            h = jax.nn.sigmoid(h)
        in_dim = feat_out
    return h


if __name__ == "__main__":
    feat_in, feat_out, num_layer = 16, 32, 3
    batch = 8

    key = jax.random.PRNGKey(0)
    key, kx = jax.random.split(key)
    x = jax.random.normal(kx, (batch, feat_in), dtype=jnp.float32)
    params = init_mlp_params(key, feat_in, feat_out, num_layer)

    out = mlp_forward(x, params, feat_in=feat_in, feat_out=feat_out)
    out = jax.block_until_ready(out)

    ref = _reference_forward(x, params, feat_in, feat_out)
    assert out.shape == (batch, feat_out), out.shape
    # bf16 matmul inputs (f32 accumulation) -> loosened tolerance vs f32 reference.
    assert jnp.allclose(out, ref, atol=2e-2, rtol=2e-2), "mismatch vs reference"

    print("KERNEL_OK")
</pallas_src>

<mosaic_0001>
module attributes {stable_mosaic.version = 11 : i64} {
  func.func @_fused_mlp_kernel(%arg0: i32, %arg1: memref<8x128xbf16, #tpu.memory_space<vmem>>, %arg2: memref<128x128xbf16, #tpu.memory_space<vmem>>, %arg3: memref<1x128xf32, #tpu.memory_space<vmem>>, %arg4: memref<128x128xbf16, #tpu.memory_space<vmem>>, %arg5: memref<1x128xf32, #tpu.memory_space<vmem>>, %arg6: memref<128x128xbf16, #tpu.memory_space<vmem>>, %arg7: memref<1x128xf32, #tpu.memory_space<vmem>>, %arg8: memref<8x128xf32, #tpu.memory_space<vmem>>) attributes {dimension_semantics = [#tpu.dimension_semantics<parallel>], iteration_bounds = array<i64: 1>, scalar_prefetch = 0 : i64, scratch_operands = 0 : i64, tpu.core_type = #tpu.core_type<tc>, window_params = [{transform_indices = @transform_0, window_bounds = array<i64: 8, 128>}, {pipeline_mode = #tpu.pipeline_mode<synchronous>, transform_indices = @transform_1, window_bounds = array<i64: 128, 128>}, {pipeline_mode = #tpu.pipeline_mode<synchronous>, transform_indices = @transform_2, window_bounds = array<i64: 1, 128>}, {pipeline_mode = #tpu.pipeline_mode<synchronous>, transform_indices = @transform_3, window_bounds = array<i64: 128, 128>}, {pipeline_mode = #tpu.pipeline_mode<synchronous>, transform_indices = @transform_4, window_bounds = array<i64: 1, 128>}, {pipeline_mode = #tpu.pipeline_mode<synchronous>, transform_indices = @transform_5, window_bounds = array<i64: 128, 128>}, {pipeline_mode = #tpu.pipeline_mode<synchronous>, transform_indices = @transform_6, window_bounds = array<i64: 1, 128>}, {transform_indices = @transform_7, window_bounds = array<i64: 8, 128>}]} {
    %c0 = arith.constant 0 : index
    %c0_0 = arith.constant 0 : index
    %0 = vector.load %arg1[%c0, %c0_0] : memref<8x128xbf16, #tpu.memory_space<vmem>>, vector<8x128xbf16>
    %c0_1 = arith.constant 0 : index
    %c0_2 = arith.constant 0 : index
    %1 = vector.load %arg2[%c0_1, %c0_2] : memref<128x128xbf16, #tpu.memory_space<vmem>>, vector<128x128xbf16>
    %cst = arith.constant dense<0.000000e+00> : vector<8x128xf32>
    %2 = tpu.matmul %0, %1, %cst {dimension_numbers = #tpu.dot_dimension_numbers<[1], [0], [0], [1], [0, 0, 1, 1], [], []>} : vector<8x128xbf16>, vector<128x128xbf16>, vector<8x128xf32> -> vector<8x128xf32>
    %c0_3 = arith.constant 0 : index
    %c0_4 = arith.constant 0 : index
    %3 = vector.load %arg3[%c0_3, %c0_4] : memref<1x128xf32, #tpu.memory_space<vmem>>, vector<1x128xf32>
    %4 = vector.broadcast %3 : vector<1x128xf32> to vector<8x128xf32>
    %5 = arith.addf %2, %4 : vector<8x128xf32>
    %6 = arith.negf %5 : vector<8x128xf32>
    %7 = math.exp %6 : vector<8x128xf32>
    %cst_5 = arith.constant 1.000000e+00 : f32
    %8 = vector.broadcast %cst_5 : f32 to vector<8x128xf32>
    %9 = arith.addf %8, %7 : vector<8x128xf32>
    %10 = arith.divf %8, %9 : vector<8x128xf32>
    %11 = arith.truncf %10 : vector<8x128xf32> to vector<8x128xbf16>
    %c0_6 = arith.constant 0 : index
    %c0_7 = arith.constant 0 : index
    %12 = vector.load %arg4[%c0_6, %c0_7] : memref<128x128xbf16, #tpu.memory_space<vmem>>, vector<128x128xbf16>
    %cst_8 = arith.constant dense<0.000000e+00> : vector<8x128xf32>
    %13 = tpu.matmul %11, %12, %cst_8 {dimension_numbers = #tpu.dot_dimension_numbers<[1], [0], [0], [1], [0, 0, 1, 1], [], []>} : vector<8x128xbf16>, vector<128x128xbf16>, vector<8x128xf32> -> vector<8x128xf32>
    %c0_9 = arith.constant 0 : index
    %c0_10 = arith.constant 0 : index
    %14 = vector.load %arg5[%c0_9, %c0_10] : memref<1x128xf32, #tpu.memory_space<vmem>>, vector<1x128xf32>
    %15 = vector.broadcast %14 : vector<1x128xf32> to vector<8x128xf32>
    %16 = arith.addf %13, %15 : vector<8x128xf32>
    %17 = arith.negf %16 : vector<8x128xf32>
    %18 = math.exp %17 : vector<8x128xf32>
    %cst_11 = arith.constant 1.000000e+00 : f32
    %19 = vector.broadcast %cst_11 : f32 to vector<8x128xf32>
    %20 = arith.addf %19, %18 : vector<8x128xf32>
    %21 = arith.divf %19, %20 : vector<8x128xf32>
    %22 = arith.truncf %21 : vector<8x128xf32> to vector<8x128xbf16>
    %c0_12 = arith.constant 0 : index
    %c0_13 = arith.constant 0 : index
    %23 = vector.load %arg6[%c0_12, %c0_13] : memref<128x128xbf16, #tpu.memory_space<vmem>>, vector<128x128xbf16>
    %cst_14 = arith.constant dense<0.000000e+00> : vector<8x128xf32>
    %24 = tpu.matmul %22, %23, %cst_14 {dimension_numbers = #tpu.dot_dimension_numbers<[1], [0], [0], [1], [0, 0, 1, 1], [], []>} : vector<8x128xbf16>, vector<128x128xbf16>, vector<8x128xf32> -> vector<8x128xf32>
    %c0_15 = arith.constant 0 : index
    %c0_16 = arith.constant 0 : index
    %25 = vector.load %arg7[%c0_15, %c0_16] : memref<1x128xf32, #tpu.memory_space<vmem>>, vector<1x128xf32>
    %26 = vector.broadcast %25 : vector<1x128xf32> to vector<8x128xf32>
    %27 = arith.addf %24, %26 : vector<8x128xf32>
    %c0_17 = arith.constant 0 : index
    %c0_18 = arith.constant 0 : index
    %28 = vector.load %arg8[%c0_17, %c0_18] : memref<8x128xf32, #tpu.memory_space<vmem>>, vector<8x128xf32>
    tpu.vector_store %arg8[%c0_17, %c0_18], %27 {strides = array<i32>} : memref<8x128xf32, #tpu.memory_space<vmem>>, vector<8x128xf32>,
    return
  }
  func.func @transform_0(%arg0: i32) -> (i32, i32) {
    %c0_i32 = arith.constant 0 : i32
    %c0_i32_0 = arith.constant 0 : i32
    return %arg0, %c0_i32 : i32, i32
  }
  func.func @transform_1(%arg0: i32) -> (i32, i32) {
    %c0_i32 = arith.constant 0 : i32
    %c0_i32_0 = arith.constant 0 : i32
    %c0_i32_1 = arith.constant 0 : i32
    return %c0_i32, %c0_i32_0 : i32, i32
  }
  func.func @transform_2(%arg0: i32) -> (i32, i32) {
    %c0_i32 = arith.constant 0 : i32
    %c0_i32_0 = arith.constant 0 : i32
    %c0_i32_1 = arith.constant 0 : i32
    return %c0_i32, %c0_i32_0 : i32, i32
  }
  func.func @transform_3(%arg0: i32) -> (i32, i32) {
    %c0_i32 = arith.constant 0 : i32
    %c0_i32_0 = arith.constant 0 : i32
    %c0_i32_1 = arith.constant 0 : i32
    return %c0_i32, %c0_i32_0 : i32, i32
  }
  func.func @transform_4(%arg0: i32) -> (i32, i32) {
    %c0_i32 = arith.constant 0 : i32
    %c0_i32_0 = arith.constant 0 : i32
    %c0_i32_1 = arith.constant 0 : i32
    return %c0_i32, %c0_i32_0 : i32, i32
  }
  func.func @transform_5(%arg0: i32) -> (i32, i32) {
    %c0_i32 = arith.constant 0 : i32
    %c0_i32_0 = arith.constant 0 : i32
    %c0_i32_1 = arith.constant 0 : i32
    return %c0_i32, %c0_i32_0 : i32, i32
  }
  func.func @transform_6(%arg0: i32) -> (i32, i32) {
    %c0_i32 = arith.constant 0 : i32
    %c0_i32_0 = arith.constant 0 : i32
    %c0_i32_1 = arith.constant 0 : i32
    return %c0_i32, %c0_i32_0 : i32, i32
  }
  func.func @transform_7(%arg0: i32) -> (i32, i32) {
    %c0_i32 = arith.constant 0 : i32
    %c0_i32_0 = arith.constant 0 : i32
    return %arg0, %c0_i32 : i32, i32
  }
}

</mosaic_0001>

<bundles_post_ra>
// kernel: mlp_forward.1
= control target key start
LH: loop header
LB: loop body
LE: loop exit
PB: predicated region body
PF: predicated region fallthrough
CT: control target
= control target key end

     0   :  { %12 = vsyncpa [#allocation3], 0  ;;  %s688_s0 = inlined_call_operand.vmem [shape: bf16[8,128], index: 0, kind: input, shape index: {}]   ;;  %s689_s1 = inlined_call_operand.hbm [shape: bf16[128,128], index: 1, kind: input, shape index: {}]   ;;  %s690_s2 = inlined_call_operand.vmem [shape: f32[1,128], index: 2, kind: input, shape index: {}]   ;;  %s691_s3 = inlined_call_operand.hbm [shape: bf16[128,128], index: 3, kind: input, shape index: {}]   ;;  %s692_s4 = inlined_call_operand.vmem [shape: f32[1,128], index: 4, kind: input, shape index: {}]   ;;  %s693_s5 = inlined_call_operand.hbm [shape: bf16[128,128], index: 5, kind: input, shape index: {}]   ;;  %s694_s6 = inlined_call_operand.vmem [shape: f32[1,128], index: 6, kind: input, shape index: {}]   ;;  %s695_s7 = inlined_call_operand.hbm [shape: f32[8,128], index: 7, kind: output, shape index: {}]  }
   0x1   :  { %13 = vsyncpa [#allocation6], 0 }
   0x2   :  { %14 = vsyncpa [#allocation4], 0  ;;  %s36_s26 = sshll.u32 %s691_s3, 4  ;;  %s618_s27 = smov [#allocation5]   ;;  %s37_s26 = int_to_ptr.hbm [resolvable:$true] %s36_s26 }
   0x3   :  { %s38_s28 = sshll.u32 %s618_s27, 4  ;;  %s21_s8 = sshll.u32 %s689_s1, 4  ;;  %s39_s28 = int_to_ptr.vmem [resolvable:$true] %s38_s28  ;;  %s22_s8 = int_to_ptr.hbm [resolvable:$true] %s21_s8 }
   0x4   :  { %s619_s9 = smov 64   ;;  %s620_s10 = smov 4  }
   0x5   :  { %44 = dma.hbm_to_vmem [thread:$0]  %s37_s26, 1024, %s39_s28, [#allocation6], %s619_s9, %s619_s9, %s620_s10  }
   0x6   :  { %s621_s11 = smov [#allocation2]   ;;  %s51_s15 = sshll.u32 %s693_s5, 4  ;;  %s52_s15 = int_to_ptr.hbm [resolvable:$true] %s51_s15 }
   0x7   :  { %s23_s12 = sshll.u32 %s621_s11, 4  ;;  %s622_s3 = smov [#allocation7]   ;;  %s24_s12 = int_to_ptr.vmem [resolvable:$true] %s23_s12 }
   0x8   :  { %29 = dma.hbm_to_vmem [thread:$0]  %s22_s8, 1024, %s24_s12, [#allocation3], %s619_s9, %s619_s9, %s620_s10  }
   0x9   :  { %s53_s16 = sshll.u32 %s622_s3, 4  ;;  %s54_s16 = int_to_ptr.vmem [resolvable:$true] %s53_s16 }
   0xa   :  { %59 = dma.hbm_to_vmem [thread:$0]  %s52_s15, 1024, %s54_s16, [#allocation6], %s619_s9, %s619_s9, %s620_s10  }
   0xb   :  { %612 = dma.done.wait [#allocation3], 1024  }
   0xc   :  { %613 = vsyncadd [#allocation3], 4294966272 }
   0xd   :  { %614 = dma.done.wait [#allocation6], 2048  }
   0xe   :  { %615 = vsyncadd [#allocation6], 4294965248  ;;  %v482_v0 = vld [vmem:[#allocation2 + $0x38] sm:$0xff]  ;;  %v481_v1 = vld [vmem:[#allocation2 + $0x30] sm:$0xff]  ;;  %s623_s20 = smov [#allocation8]   ;;  %s366_s24 = sshll.u32 %s695_s7, 4  ;;  %s367_s24 = int_to_ptr.hbm [resolvable:$true] %s366_s24 }
   0xf   :  { %143 = vmatpush.bf16.msra.mxu0 %v482_v0  ;;  %v480_v2 = vld [vmem:[#allocation2 + $0x28] sm:$0xff]  ;;  %v479_v3 = vld [vmem:[#allocation2 + $0x20] sm:$0xff]  ;;  %v478_v4 = vld [vmem:[#allocation2 + $0x18] sm:$0xff]  ;;  %s364_s21 = sshll.u32 %s623_s20, 4  ;;  %s365_s21 = int_to_ptr.vmem [resolvable:$true] %s364_s21 }
  0x10   :  { %v477_v5 = vld [vmem:[#allocation2 + $0x10] sm:$0xff]  ;;  %v476_v6 = vld [vmem:[#allocation2 + $0x8] sm:$0xff]  ;;  %v475_v7 = vld [vmem:[#allocation2] sm:$0xff] }
  0x11   :  { %v74_v8 = vld [vmem:[%s688_s0] sm:$0xf]  ;;  %v490_v9 = vld [vmem:[#allocation5 + $0x38] sm:$0xff]  ;;  %v489_v10 = vld [vmem:[#allocation5 + $0x30] sm:$0xff] }
  0x12   :  { %244 = vmatpush.bf16.msra.mxu1 %v490_v9  ;;  %v488_v11 = vld [vmem:[#allocation5 + $0x28] sm:$0xff]  ;;  %v487_v12 = vld [vmem:[#allocation5 + $0x20] sm:$0xff]  ;;  %v486_v13 = vld [vmem:[#allocation5 + $0x18] sm:$0xff] }
  0x13   :  { %144 = vmatpush.bf16.msra.mxu0 %v481_v1  ;;  %v485_v14 = vld [vmem:[#allocation5 + $0x10] sm:$0xff]  ;;  %v484_v15 = vld [vmem:[#allocation5 + $0x8] sm:$0xff]  ;;  %v483_v16 = vld [vmem:[#allocation5] sm:$0xff] }
  0x14   :  { %v505_v17 = vld [vmem:[%s690_s2] ss:$0 sm:$0xff]  ;;  %v498_v35 = vld [vmem:[#allocation7 + $0x38] sm:$0xff]  ;;  %v497_v36 = vld [vmem:[#allocation7 + $0x30] sm:$0xff] }
  0x15   :  { %345 = vmatpush.bf16.msra.mxu2 %v498_v35  ;;  %v496_v37 = vld [vmem:[#allocation7 + $0x28] sm:$0xff]  ;;  %v495_v38 = vld [vmem:[#allocation7 + $0x20] sm:$0xff]  ;;  %v494_v39 = vld [vmem:[#allocation7 + $0x18] sm:$0xff] }
  0x16   :  { %245 = vmatpush.bf16.msra.mxu1 %v489_v10  ;;  %v493_v40 = vld [vmem:[#allocation7 + $0x10] sm:$0xff]  ;;  %v492_v41 = vld [vmem:[#allocation7 + $0x8] sm:$0xff]  ;;  %v491_v42 = vld [vmem:[#allocation7] sm:$0xff] }
  0x17   :  { %145 = vmatpush.bf16.msra.mxu0 %v480_v2  ;;  %v506_v43 = vld [vmem:[%s692_s4] ss:$0 sm:$0xff] }
  0x18   :  { %v507_v61 = vld [vmem:[%s694_s6] ss:$0 sm:$0xff] }
  0x19   :  { %346 = vmatpush.bf16.msra.mxu2 %v497_v36 }
  0x1a   :  { %246 = vmatpush.bf16.msra.mxu1 %v488_v11 }
  0x1b   :  { %146 = vmatpush.bf16.msra.mxu0 %v479_v3 }
  0x1d   :  { %347 = vmatpush.bf16.msra.mxu2 %v496_v37 }
  0x1e   :  { %247 = vmatpush.bf16.msra.mxu1 %v487_v12 }
  0x1f   :  { %147 = vmatpush.bf16.msra.mxu0 %v478_v4 }
  0x21   :  { %348 = vmatpush.bf16.msra.mxu2 %v495_v38 }
  0x22   :  { %248 = vmatpush.bf16.msra.mxu1 %v486_v13 }
  0x23   :  { %148 = vmatpush.bf16.msra.mxu0 %v477_v5 }
  0x25   :  { %349 = vmatpush.bf16.msra.mxu2 %v494_v39 }
  0x26   :  { %249 = vmatpush.bf16.msra.mxu1 %v485_v14 }
  0x27   :  { %149 = vmatpush.bf16.msra.mxu0 %v476_v6 }
  0x29   :  { %350 = vmatpush.bf16.msra.mxu2 %v493_v40 }
  0x2a   :  { %250 = vmatpush.bf16.msra.mxu1 %v484_v15 }
  0x2b   :  { %150 = vmatpush.bf16.msra.mxu0 %v475_v7 }
  0x2d   :  { %351 = vmatpush.bf16.msra.mxu2 %v492_v41 }
  0x2e   :  { %151 = vmatmul.bf16.vlgmr.msra.gmra.mxu0 %v74_v8  ;;  %251 = vmatpush.bf16.msra.mxu1 %v483_v16 }
  0x31   :  { %352 = vmatpush.bf16.msra.mxu2 %v491_v42 }
  0xab   :  { %v152_v18 = vpop.f32.mrf.mxu0 }
  0xac   :  { %v153_v19 = vadd.f32 %v505_v17, %v152_v18 }
  0xae   :  { %v409_v20 = vmul.f32 -1.442695, %v153_v19 }
  0xb0   :  { %508 = vpow2.f32 %v409_v20 }
  0xb3   :  { %v154_v21 = vpop.f32.mrf.mxu0 }
  0xb6   :  { %v509_v22 = vpop.eup %508 }
  0xb7   :  { %v159_v23 = vadd.f32 1.0, %v509_v22 }
  0xb9   :  { %510 = vrcp.f32 %v159_v23  ;;  %v171_v27 = vand.u32 2147483648, %v159_v23  ;;  %v169_v29 = vand.u32 2147483647, %v159_v23  ;;  %vm165_vm1 = vweird.f32 %v159_v23 }
  0xbb   :  { %v172_v31 = vor.u32 1.1754944e-38, %v171_v27  ;;  %vm170_vm3 = vcmp.eq.f32.partialorder %v169_v29, 8.507059e+37 }
  0xbf   :  { %v511_v24 = vpop.eup %510 }
  0xc0   :  { %v161_v25 = vmul.f32 %v511_v24, %v159_v23  ;;  %vm166_vm0 = vweird.f32 %v511_v24 }
  0xc1   :  { %vm167_vm2 = vmor %vm165_vm1, %vm166_vm0 }
  0xc2   :  { %v162_v26 = vsub.f32 1.0, %v161_v25 }
  0xc4   :  { %v163_v28 = vmul.f32 %v511_v24, %v162_v26 }
  0xc6   :  { %v164_v30 = vadd.f32 %v511_v24, %v163_v28 }
  0xc8   :  { %v168_v32 = vsel %vm167_vm2, %v511_v24, %v164_v30 }
  0xc9   :  { %v173_v33 = vsel %vm170_vm3, %v172_v31, %v168_v32 }
  0xca   :  { %v175_v34 = vpack.c.bf16 %v173_v33, %v173_v33 }
  0xcc   :  { %252 = vmatmul.bf16.vlgmr.msra.gmra.mxu1 %v175_v34 }
 0x149   :  { %v253_v44 = vpop.f32.mrf.mxu1 }
 0x14a   :  { %v254_v45 = vadd.f32 %v506_v43, %v253_v44 }
 0x14c   :  { %v442_v46 = vmul.f32 -1.442695, %v254_v45 }
 0x14e   :  { %512 = vpow2.f32 %v442_v46 }
 0x151   :  { %v255_v47 = vpop.f32.mrf.mxu1 }
 0x154   :  { %v513_v48 = vpop.eup %512 }
 0x155   :  { %v260_v49 = vadd.f32 1.0, %v513_v48 }
 0x157   :  { %514 = vrcp.f32 %v260_v49  ;;  %v272_v53 = vand.u32 2147483648, %v260_v49  ;;  %v270_v55 = vand.u32 2147483647, %v260_v49  ;;  %vm266_vm5 = vweird.f32 %v260_v49 }
 0x159   :  { %v273_v57 = vor.u32 1.1754944e-38, %v272_v53  ;;  %vm271_vm7 = vcmp.eq.f32.partialorder %v270_v55, 8.507059e+37 }
 0x15d   :  { %v515_v50 = vpop.eup %514 }
 0x15e   :  { %v262_v51 = vmul.f32 %v515_v50, %v260_v49  ;;  %vm267_vm4 = vweird.f32 %v515_v50 }
 0x15f   :  { %vm268_vm6 = vmor %vm266_vm5, %vm267_vm4 }
 0x160   :  { %v263_v52 = vsub.f32 1.0, %v262_v51 }
 0x162   :  { %v264_v54 = vmul.f32 %v515_v50, %v263_v52 }
 0x164   :  { %v265_v56 = vadd.f32 %v515_v50, %v264_v54 }
 0x166   :  { %v269_v58 = vsel %vm268_vm6, %v515_v50, %v265_v56 }
 0x167   :  { %v274_v59 = vsel %vm271_vm7, %v273_v57, %v269_v58 }
 0x168   :  { %v276_v60 = vpack.c.bf16 %v274_v59, %v274_v59 }
 0x16a   :  { %353 = vmatmul.bf16.vlgmr.msra.gmra.mxu2 %v276_v60 }
 0x1ed   :  { %v354_v62 = vpop.f32.mrf.mxu2 }
 0x1ee   :  { %v355_v63 = vadd.f32 %v507_v61, %v354_v62 }
 0x1f0   :  { %358 = vst [vmem:[#allocation8] sm:$0xff] %v355_v63 }
 0x1f1   :  { %369 = dma.vmem_to_hbm [thread:$0]  %s365_s21, 128, %s367_s24, [#allocation4]  }
 0x1f5   :  { %v356_v0 = vpop.f32.mrf.mxu2 }
 0x1f6   :  { %616 = dma.done.wait [#allocation4], 128  }
 0x1f7   :  { %617 = vsyncadd [#allocation4], 4294967168 }
 0x1f8   :  { %374 = vsyncpa [#allocation3], 1 }
 0x1f9   :  { %375 = vsyncpa [#allocation6], 1 }
 0x1fa   :  { %376 = vsyncpa [#allocation4], 1 }

</bundles_post_ra>
